<compile_context>
chip_gen: v7x
topology: tpu7x:2x2x1
jax: 0.10.0
libtpu: 0.0.40
codegen_flags: <defaults>
</compile_context>

<pallas_src>
import jax
import jax.numpy as jnp
from jax.experimental import pallas as pl
from jax.experimental.pallas import tpu as pltpu


_TARGET_TILE_BYTES = 2 * 1024 * 1024   # ~2 MiB/buffer -> near HBM roofline
_VMEM_LIMIT_BYTES = 32 * 1024 * 1024   # explicit scoped-VMEM limit (all chips)


def _copy_kernel(x_ref, o_ref):
    # Pure elementwise pass-through of the current VMEM tile.
    o_ref[...] = x_ref[...]


def _choose_cols(n):
    """Largest lane-dense width (multiple of 128) dividing n, else pad to 1024."""
    for c in (1024, 512, 256, 128):
        if n % c == 0:
            return c, 0
    padded = ((n + 1023) // 1024) * 1024
    return 1024, padded - n


@jax.jit
def neuroclips_forward(x):
    """Identity forward pass of Neuroclips as a Pallas TPU copy kernel."""
    orig_shape = x.shape
    n = x.size

    # Flatten the whole tensor to a lane-dense 2D slab (cols % 128 == 0).
    flat = x.reshape(-1)
    cols, pad = _choose_cols(n)
    if pad:
        flat = jnp.pad(flat, (0, pad))
    rows = flat.size // cols
    x2 = flat.reshape(rows, cols)

    # Fixed (8,128)-aligned row tile targeting ~2 MiB per buffer; Pallas
    # handles the ragged last block if rows % tr != 0.
    itemsize = jnp.dtype(x.dtype).itemsize
    tr = max(8, _TARGET_TILE_BYTES // (cols * itemsize))
    tr = (tr // 8) * 8
    tr = min(tr, rows)
    grid = (pl.cdiv(rows, tr),)

    out2 = pl.pallas_call(
        _copy_kernel,
        out_shape=jax.ShapeDtypeStruct((rows, cols), x2.dtype),
        grid=grid,
        in_specs=[pl.BlockSpec((tr, cols), lambda i: (i, 0))],
        out_specs=pl.BlockSpec((tr, cols), lambda i: (i, 0)),
        # Identity path: alias output onto the input buffer (no new HBM alloc).
        input_output_aliases={0: 0},
        compiler_params=pltpu.CompilerParams(
            dimension_semantics=("parallel",),
            vmem_limit_bytes=_VMEM_LIMIT_BYTES,
        ),
    )(x2)

    out_flat = out2.reshape(-1)
    if pad:
        out_flat = out_flat[:n]
    return out_flat.reshape(orig_shape)


if __name__ == "__main__":
    key = jax.random.PRNGKey(0)
    # Small NCHW input consistent with an image-like module input.
    x = jax.random.normal(key, (2, 4, 16, 16), dtype=jnp.float32)

    y = neuroclips_forward(x)
    y = jax.block_until_ready(y)

    assert y.shape == x.shape and y.dtype == x.dtype
    assert bool(jnp.array_equal(y, x))
    print("KERNEL_OK")
</pallas_src>

<mosaic_0001>
module attributes {stable_mosaic.version = 11 : i64} {
  func.func @_copy_kernel(%arg0: i32, %arg1: memref<2x1024xf32, #tpu.memory_space<vmem>>, %arg2: memref<2x1024xf32, #tpu.memory_space<vmem>>) attributes {dimension_semantics = [#tpu.dimension_semantics<parallel>], iteration_bounds = array<i64: 1>, scalar_prefetch = 0 : i64, scratch_operands = 0 : i64, tpu.core_type = #tpu.core_type<tc>, window_params = [{transform_indices = @transform_0, window_bounds = array<i64: 2, 1024>}, {transform_indices = @transform_1, window_bounds = array<i64: 2, 1024>}]} {
    %c0 = arith.constant 0 : index
    %c0_0 = arith.constant 0 : index
    %0 = vector.load %arg1[%c0, %c0_0] : memref<2x1024xf32, #tpu.memory_space<vmem>>, vector<2x1024xf32>
    %c0_1 = arith.constant 0 : index
    %c0_2 = arith.constant 0 : index
    %1 = vector.load %arg2[%c0_1, %c0_2] : memref<2x1024xf32, #tpu.memory_space<vmem>>, vector<2x1024xf32>
    tpu.vector_store %arg2[%c0_1, %c0_2], %0 {strides = array<i32>} : memref<2x1024xf32, #tpu.memory_space<vmem>>, vector<2x1024xf32>,
    return
  }
  func.func @transform_0(%arg0: i32) -> (i32, i32) {
    %c0_i32 = arith.constant 0 : i32
    %c0_i32_0 = arith.constant 0 : i32
    return %arg0, %c0_i32 : i32, i32
  }
  func.func @transform_1(%arg0: i32) -> (i32, i32) {
    %c0_i32 = arith.constant 0 : i32
    %c0_i32_0 = arith.constant 0 : i32
    return %arg0, %c0_i32 : i32, i32
  }
}

</mosaic_0001>

<bundles_post_ra>
// kernel: neuroclips_forward.1
= control target key start
LH: loop header
LB: loop body
LE: loop exit
PB: predicated region body
PF: predicated region fallthrough
CT: control target
= control target key end

     0   :  { %s38_s0 = inlined_call_operand.vmem [shape: f32[2,1024], index: 0, kind: input, shape index: {}, may-alias: {0,1}]   ;;  %s39_s1 = inlined_call_operand.vmem [shape: f32[2,1024], index: 1, kind: output, shape index: {}, may-alias: {0,1}]  }
   0x1   :  { %v8_v0 = vld [vmem:[%s38_s0] sm:$0xff]  ;;  %v9_v1 = vld [vmem:[%s38_s0 + $0x8] sm:$0xff] }
   0x2   :  { %10 = vst [vmem:[%s39_s1] sm:$0xff] %v8_v0  ;;  %11 = vst [vmem:[%s39_s1 + $0x8] sm:$0xff] %v9_v1 }

</bundles_post_ra>
